<compile_context>
chip_gen: v6e
topology: v6e:2x2x1
jax: 0.10.0
libtpu: 0.0.40
codegen_flags: <defaults>
</compile_context>

<pallas_src>
import jax
import jax.numpy as jnp
from jax.experimental import pallas as pl
from jax.experimental.pallas import tpu as pltpu


def _round_up(x, m):
    return ((x + m - 1) // m) * m


def _cdiv(a, b):
    return -(-a // b)


def _vmem_capacity_bytes():
    """Best-effort VMEM capacity query; conservative (v7x) fallback."""
    try:
        info = pltpu.get_tpu_info()
        for name in ("vmem_capacity_bytes", "vmem_size_bytes", "vmem_bytes"):
            v = getattr(info, name, None)
            if v:
                return int(v)
    except Exception:
        pass
    return 64 * 1024 * 1024


def _plan(B, D1, D2, isz1, isz2, x_isz):
    """Static tiling plan: chunk layout, lane tile sizes, grid, VMEM budget."""
    sub = 8 * max(1, 4 // x_isz)                  # sublane packing multiple
    P = _round_up(max(B, 1), sub)                 # aligned rows per chunk
    half = max(1, 64 // P)                        # chunks per input (S <= ~128)
    nca = max(1, min(half, _cdiv(D1, 128)))
    ncb = max(1, min(half, _cdiv(D2, 128)))
    S = (nca + ncb) * P                           # stacked operand rows

    # VMEM budget: double-buffered input blocks + the stacked-operand scratch.
    big = _vmem_capacity_bytes() >= 100 * 1024 * 1024   # v5e/v6e vs v7x
    budget = (36 if big else 14) * 1024 * 1024
    vmem_limit = (80 if big else 32) * 1024 * 1024
    per_lane = 2 * B * (nca * isz1 + ncb * isz2) + S * x_isz
    c_cap = max(128, (budget // per_lane) // 128 * 128)  # lanes per chunk cap

    n_total = max(_cdiv(D1, nca * c_cap), _cdiv(D2, ncb * c_cap), 1)
    n_split = 2 if n_total >= 2 else 1            # feeds both v7x TensorCores
    n_total = _round_up(n_total, n_split)
    n_k = n_total // n_split

    C1 = _round_up(_cdiv(D1, n_total * nca), 128)
    C2 = _round_up(_cdiv(D2, n_total * ncb), 128)
    return dict(P=P, nca=nca, ncb=ncb, S=S, C1=C1, C2=C2,
                tk1=nca * C1, tk2=ncb * C2,
                n_split=n_split, n_k=n_k, n_total=n_total,
                vmem_limit=vmem_limit)


def _make_kernel(B, P, nca, ncb, C1, C2, tk1, tk2, D1, D2, n_k, n_total,
                 x_dtype):
    mask_a = (n_total * tk1 != D1)     # ragged / overshooting tiles for a?
    mask_b = (n_total * tk2 != D2)
    off_b = nca * P                    # sublane offset of b's chunks in x_ref

    def kernel(a_ref, b_ref, r_ref, x_ref):
        c = pl.program_id(0)           # core-parallel slice of the D reduction
        k = pl.program_id(1)           # D tile within the slice
        g = c * n_k + k                # global D-block index

        @pl.when(k == 0)
        def _():
            x_ref[...] = jnp.zeros_like(x_ref)   # padding rows/lanes stay 0
            r_ref[...] = jnp.zeros_like(r_ref)   # per-slice Gram accumulator

        def scatter(src_ref, nc, C, D, tk, row0, need_mask):
            # Split the (B, tk) tile into nc chunks of C lanes and stack them
            # on the sublane axis of the shared wide operand x_ref.
            for j in range(nc):
                chunk = src_ref[:, j * C:(j + 1) * C]
                if need_mask:
                    col = jax.lax.broadcasted_iota(jnp.int32, (B, C), 1)
                    valid = (g * tk + j * C + col) < D
                    chunk = jnp.where(valid, chunk, jnp.zeros_like(chunk))
                x_ref[row0 + j * P: row0 + j * P + B, 0:C] = chunk.astype(x_dtype)

        scatter(a_ref, nca, C1, D1, tk1, 0, mask_a)
        scatter(b_ref, ncb, C2, D2, tk2, off_b, mask_b)

        # One wide X @ X^T per step: the (S, S) result holds both Grams in its
        # same-chunk diagonal blocks (cross blocks are wasted-but-free MXU
        # columns that would otherwise sit idle).
        # TODO(synk): verify with a bundle dump that this minor-minor
        # contraction uses the MXU transposed-weight push (no per-tile XLU
        # transpose); if not, feed an explicitly transposed RHS view.
        x = x_ref[...]
        r_ref[...] += jax.lax.dot_general(
            x, x, (((1,), (1,)), ((), ())),
            preferred_element_type=jnp.float32)

    return kernel


@jax.jit
def diff_loss(input1, input2):
    """Pallas implementation of DiffLoss.forward(input1, input2) -> scalar."""
    assert input1.shape[0] == input2.shape[0], "batch dims must match"
    B = input1.shape[0]
    a = input1.reshape(B, -1)          # native dtype, no copy
    b = input2.reshape(B, -1)
    D1, D2 = a.shape[1], b.shape[1]

    x_dtype = jnp.promote_types(a.dtype, b.dtype)
    if not jnp.issubdtype(x_dtype, jnp.floating):
        x_dtype = jnp.float32
    x_dtype = jnp.dtype(x_dtype)

    p = _plan(B, D1, D2, a.dtype.itemsize, b.dtype.itemsize, x_dtype.itemsize)
    P, nca, ncb, S = p["P"], p["nca"], p["ncb"], p["S"]
    C1, C2, tk1, tk2 = p["C1"], p["C2"], p["tk1"], p["tk2"]
    n_split, n_k, n_total = p["n_split"], p["n_k"], p["n_total"]
    Cmax = max(C1, C2)

    # Clamp block indices so no block starts fully out of bounds (its
    # contribution is masked to zero in-kernel anyway).
    last_a = max((D1 - 1) // tk1, 0)
    last_b = max((D2 - 1) // tk2, 0)

    kernel = _make_kernel(B, P, nca, ncb, C1, C2, tk1, tk2, D1, D2,
                          n_k, n_total, x_dtype)

    r = pl.pallas_call(
        kernel,
        out_shape=jax.ShapeDtypeStruct((n_split, S, S), jnp.float32),
        grid_spec=pltpu.PrefetchScalarGridSpec(
            num_scalar_prefetch=0,
            grid=(n_split, n_k),
            in_specs=[
                pl.BlockSpec((B, tk1),
                             lambda c, k: (0, jnp.minimum(c * n_k + k, last_a))),
                pl.BlockSpec((B, tk2),
                             lambda c, k: (0, jnp.minimum(c * n_k + k, last_b))),
            ],
            out_specs=pl.BlockSpec((None, S, S), lambda c, k: (c, 0, 0)),
            scratch_shapes=[pltpu.VMEM((S, Cmax), x_dtype)],
        ),
        compiler_params=pltpu.CompilerParams(
            dimension_semantics=("parallel", "arbitrary"),
            vmem_limit_bytes=p["vmem_limit"],
        ),
    )(a, b)

    # --- tiny epilogue in plain JAX (operates on a <= (128, 128) array) -----
    R = r.sum(axis=0)                                  # combine core partials

    def gram(off, nc):
        g = jnp.zeros((P, P), jnp.float32)
        for j in range(nc):                            # nc <= 8, static
            s = off + j * P
            g = g + R[s:s + P, s:s + P]                # same-chunk diag blocks
        return g[:B, :B]

    Ga = gram(0, nca)                                  # a @ a.T
    Gb = gram(nca * P, ncb)                            # b @ b.T

    inv_a = 1.0 / (jnp.sqrt(jnp.diagonal(Ga)) + 1e-6)  # 1 / (||a_i|| + 1e-6)
    inv_b = 1.0 / (jnp.sqrt(jnp.diagonal(Gb)) + 1e-6)
    Ga_n = Ga * inv_a[:, None] * inv_a[None, :]
    Gb_n = Gb * inv_b[:, None] * inv_b[None, :]
    return jnp.sum(Ga_n * Gb_n) / jnp.float32(float(D1) * float(D2))


# Pure-JAX reference for the sanity check.
def _diff_loss_ref(input1, input2):
    B = input1.shape[0]
    a = input1.reshape(B, -1).astype(jnp.float32)
    b = input2.reshape(B, -1).astype(jnp.float32)
    a = a / (jnp.linalg.norm(a, axis=1, keepdims=True) + 1e-6)
    b = b / (jnp.linalg.norm(b, axis=1, keepdims=True) + 1e-6)
    return jnp.mean((a.T @ b) ** 2)


if __name__ == "__main__":
    key = jax.random.PRNGKey(0)
    k1, k2 = jax.random.split(key)
    # Small NCHW feature maps, as a typical caller of DiffLoss would pass.
    x1 = jax.random.normal(k1, (2, 4, 16, 16), dtype=jnp.float32)
    x2 = jax.random.normal(k2, (2, 4, 16, 16), dtype=jnp.float32)

    out = jax.block_until_ready(diff_loss(x1, x2))
    ref = _diff_loss_ref(x1, x2)

    # MXU default (reduced) matmul precision differs slightly from pure f32;
    # both paths use the MXU, tolerance reflects that.
    assert jnp.allclose(out, ref, rtol=5e-3, atol=1e-9), (out, ref)
    print("KERNEL_OK")
</pallas_src>

<mosaic_0001>
module attributes {stable_mosaic.version = 11 : i64} {
  func.func @kernel(%arg0: i32, %arg1: i32, %arg2: memref<2x1024xf32, #tpu.memory_space<vmem>>, %arg3: memref<2x1024xf32, #tpu.memory_space<vmem>>, %arg4: memref<1x128x128xf32, #tpu.memory_space<vmem>>, %arg5: memref<128x128xf32, #tpu.memory_space<vmem>>) attributes {dimension_semantics = [#tpu.dimension_semantics<parallel>, #tpu.dimension_semantics<arbitrary>], iteration_bounds = array<i64: 1, 1>, scalar_prefetch = 0 : i64, scratch_operands = 1 : i64, tpu.core_type = #tpu.core_type<tc>, window_params = [{transform_indices = @transform_0, window_bounds = array<i64: 2, 1024>}, {transform_indices = @transform_1, window_bounds = array<i64: 2, 1024>}, {transform_indices = @transform_2, window_bounds = array<i64: 1, 128, 128>}]} {
    %c0_i32 = arith.constant 0 : i32
    %0 = arith.cmpi eq, %arg1, %c0_i32 : i32
    %1 = arith.extui %0 : i1 to i32
    %c0_i32_0 = arith.constant 0 : i32
    %2 = arith.cmpi ne, %1, %c0_i32_0 : i32
    scf.if %2 {
      %cst_50 = arith.constant 0.000000e+00 : f32
      %43 = vector.broadcast %cst_50 : f32 to vector<128x128xf32>
      %c0_51 = arith.constant 0 : index
      %c0_52 = arith.constant 0 : index
      %44 = vector.load %arg5[%c0_51, %c0_52] : memref<128x128xf32, #tpu.memory_space<vmem>>, vector<128x128xf32>
      tpu.vector_store %arg5[%c0_51, %c0_52], %43 {strides = array<i32>} : memref<128x128xf32, #tpu.memory_space<vmem>>, vector<128x128xf32>,
      %cst_53 = arith.constant 0.000000e+00 : f32
      %45 = vector.broadcast %cst_53 : f32 to vector<128x128xf32>
      %c0_54 = arith.constant 0 : index
      %c0_55 = arith.constant 0 : index
      %c0_56 = arith.constant 0 : index
      %46 = vector.load %arg4[%c0_54, %c0_55, %c0_56] : memref<1x128x128xf32, #tpu.memory_space<vmem>>, vector<1x128x128xf32>
      %47 = vector.shape_cast %46 : vector<1x128x128xf32> to vector<128x128xf32>
      %48 = vector.shape_cast %45 : vector<128x128xf32> to vector<1x128x128xf32>
      tpu.vector_store %arg4[%c0_54, %c0_55, %c0_56], %48 {strides = array<i32>} : memref<1x128x128xf32, #tpu.memory_space<vmem>>, vector<1x128x128xf32>,
    } else {
    }
    %c0 = arith.constant 0 : index
    %c0_1 = arith.constant 0 : index
    %3 = vector.load %arg2[%c0, %c0_1] : memref<2x1024xf32, #tpu.memory_space<vmem>>, vector<2x128xf32>
    %c0_2 = arith.constant 0 : index
    %c0_3 = arith.constant 0 : index
    %4 = vector.load %arg5[%c0_2, %c0_3] : memref<128x128xf32, #tpu.memory_space<vmem>>, vector<2x128xf32>
    tpu.vector_store %arg5[%c0_2, %c0_3], %3 {strides = array<i32>} : memref<128x128xf32, #tpu.memory_space<vmem>>, vector<2x128xf32>,
    %c0_4 = arith.constant 0 : index
    %c128 = arith.constant 128 : index
    %5 = vector.load %arg2[%c0_4, %c128] : memref<2x1024xf32, #tpu.memory_space<vmem>>, vector<2x128xf32>
    %c8 = arith.constant 8 : index
    %c0_5 = arith.constant 0 : index
    %6 = vector.load %arg5[%c8, %c0_5] : memref<128x128xf32, #tpu.memory_space<vmem>>, vector<2x128xf32>
    tpu.vector_store %arg5[%c8, %c0_5], %5 {strides = array<i32>} : memref<128x128xf32, #tpu.memory_space<vmem>>, vector<2x128xf32>,
    %c0_6 = arith.constant 0 : index
    %c256 = arith.constant 256 : index
    %7 = vector.load %arg2[%c0_6, %c256] : memref<2x1024xf32, #tpu.memory_space<vmem>>, vector<2x128xf32>
    %c16 = arith.constant 16 : index
    %c0_7 = arith.constant 0 : index
    %8 = vector.load %arg5[%c16, %c0_7] : memref<128x128xf32, #tpu.memory_space<vmem>>, vector<2x128xf32>
    tpu.vector_store %arg5[%c16, %c0_7], %7 {strides = array<i32>} : memref<128x128xf32, #tpu.memory_space<vmem>>, vector<2x128xf32>,
    %c0_8 = arith.constant 0 : index
    %c384 = arith.constant 384 : index
    %9 = vector.load %arg2[%c0_8, %c384] : memref<2x1024xf32, #tpu.memory_space<vmem>>, vector<2x128xf32>
    %c24 = arith.constant 24 : index
    %c0_9 = arith.constant 0 : index
    %10 = vector.load %arg5[%c24, %c0_9] : memref<128x128xf32, #tpu.memory_space<vmem>>, vector<2x128xf32>
    tpu.vector_store %arg5[%c24, %c0_9], %9 {strides = array<i32>} : memref<128x128xf32, #tpu.memory_space<vmem>>, vector<2x128xf32>,
    %c0_10 = arith.constant 0 : index
    %c512 = arith.constant 512 : index
    %11 = vector.load %arg2[%c0_10, %c512] : memref<2x1024xf32, #tpu.memory_space<vmem>>, vector<2x128xf32>
    %c32 = arith.constant 32 : index
    %c0_11 = arith.constant 0 : index
    %12 = vector.load %arg5[%c32, %c0_11] : memref<128x128xf32, #tpu.memory_space<vmem>>, vector<2x128xf32>
    tpu.vector_store %arg5[%c32, %c0_11], %11 {strides = array<i32>} : memref<128x128xf32, #tpu.memory_space<vmem>>, vector<2x128xf32>,
    %c0_12 = arith.constant 0 : index
    %c640 = arith.constant 640 : index
    %13 = vector.load %arg2[%c0_12, %c640] : memref<2x1024xf32, #tpu.memory_space<vmem>>, vector<2x128xf32>
    %c40 = arith.constant 40 : index
    %c0_13 = arith.constant 0 : index
    %14 = vector.load %arg5[%c40, %c0_13] : memref<128x128xf32, #tpu.memory_space<vmem>>, vector<2x128xf32>
    tpu.vector_store %arg5[%c40, %c0_13], %13 {strides = array<i32>} : memref<128x128xf32, #tpu.memory_space<vmem>>, vector<2x128xf32>,
    %c0_14 = arith.constant 0 : index
    %c768 = arith.constant 768 : index
    %15 = vector.load %arg2[%c0_14, %c768] : memref<2x1024xf32, #tpu.memory_space<vmem>>, vector<2x128xf32>
    %c48 = arith.constant 48 : index
    %c0_15 = arith.constant 0 : index
    %16 = vector.load %arg5[%c48, %c0_15] : memref<128x128xf32, #tpu.memory_space<vmem>>, vector<2x128xf32>
    tpu.vector_store %arg5[%c48, %c0_15], %15 {strides = array<i32>} : memref<128x128xf32, #tpu.memory_space<vmem>>, vector<2x128xf32>,
    %c0_16 = arith.constant 0 : index
    %c896 = arith.constant 896 : index
    %17 = vector.load %arg2[%c0_16, %c896] : memref<2x1024xf32, #tpu.memory_space<vmem>>, vector<2x128xf32>
    %c56 = arith.constant 56 : index
    %c0_17 = arith.constant 0 : index
    %18 = vector.load %arg5[%c56, %c0_17] : memref<128x128xf32, #tpu.memory_space<vmem>>, vector<2x128xf32>
    tpu.vector_store %arg5[%c56, %c0_17], %17 {strides = array<i32>} : memref<128x128xf32, #tpu.memory_space<vmem>>, vector<2x128xf32>,
    %c0_18 = arith.constant 0 : index
    %c0_19 = arith.constant 0 : index
    %19 = vector.load %arg3[%c0_18, %c0_19] : memref<2x1024xf32, #tpu.memory_space<vmem>>, vector<2x128xf32>
    %c64 = arith.constant 64 : index
    %c0_20 = arith.constant 0 : index
    %20 = vector.load %arg5[%c64, %c0_20] : memref<128x128xf32, #tpu.memory_space<vmem>>, vector<2x128xf32>
    tpu.vector_store %arg5[%c64, %c0_20], %19 {strides = array<i32>} : memref<128x128xf32, #tpu.memory_space<vmem>>, vector<2x128xf32>,
    %c0_21 = arith.constant 0 : index
    %c128_22 = arith.constant 128 : index
    %21 = vector.load %arg3[%c0_21, %c128_22] : memref<2x1024xf32, #tpu.memory_space<vmem>>, vector<2x128xf32>
    %c72 = arith.constant 72 : index
    %c0_23 = arith.constant 0 : index
    %22 = vector.load %arg5[%c72, %c0_23] : memref<128x128xf32, #tpu.memory_space<vmem>>, vector<2x128xf32>
    tpu.vector_store %arg5[%c72, %c0_23], %21 {strides = array<i32>} : memref<128x128xf32, #tpu.memory_space<vmem>>, vector<2x128xf32>,
    %c0_24 = arith.constant 0 : index
    %c256_25 = arith.constant 256 : index
    %23 = vector.load %arg3[%c0_24, %c256_25] : memref<2x1024xf32, #tpu.memory_space<vmem>>, vector<2x128xf32>
    %c80 = arith.constant 80 : index
    %c0_26 = arith.constant 0 : index
    %24 = vector.load %arg5[%c80, %c0_26] : memref<128x128xf32, #tpu.memory_space<vmem>>, vector<2x128xf32>
    tpu.vector_store %arg5[%c80, %c0_26], %23 {strides = array<i32>} : memref<128x128xf32, #tpu.memory_space<vmem>>, vector<2x128xf32>,
    %c0_27 = arith.constant 0 : index
    %c384_28 = arith.constant 384 : index
    %25 = vector.load %arg3[%c0_27, %c384_28] : memref<2x1024xf32, #tpu.memory_space<vmem>>, vector<2x128xf32>
    %c88 = arith.constant 88 : index
    %c0_29 = arith.constant 0 : index
    %26 = vector.load %arg5[%c88, %c0_29] : memref<128x128xf32, #tpu.memory_space<vmem>>, vector<2x128xf32>
    tpu.vector_store %arg5[%c88, %c0_29], %25 {strides = array<i32>} : memref<128x128xf32, #tpu.memory_space<vmem>>, vector<2x128xf32>,
    %c0_30 = arith.constant 0 : index
    %c512_31 = arith.constant 512 : index
    %27 = vector.load %arg3[%c0_30, %c512_31] : memref<2x1024xf32, #tpu.memory_space<vmem>>, vector<2x128xf32>
    %c96 = arith.constant 96 : index
    %c0_32 = arith.constant 0 : index
    %28 = vector.load %arg5[%c96, %c0_32] : memref<128x128xf32, #tpu.memory_space<vmem>>, vector<2x128xf32>
    tpu.vector_store %arg5[%c96, %c0_32], %27 {strides = array<i32>} : memref<128x128xf32, #tpu.memory_space<vmem>>, vector<2x128xf32>,
    %c0_33 = arith.constant 0 : index
    %c640_34 = arith.constant 640 : index
    %29 = vector.load %arg3[%c0_33, %c640_34] : memref<2x1024xf32, #tpu.memory_space<vmem>>, vector<2x128xf32>
    %c104 = arith.constant 104 : index
    %c0_35 = arith.constant 0 : index
    %30 = vector.load %arg5[%c104, %c0_35] : memref<128x128xf32, #tpu.memory_space<vmem>>, vector<2x128xf32>
    tpu.vector_store %arg5[%c104, %c0_35], %29 {strides = array<i32>} : memref<128x128xf32, #tpu.memory_space<vmem>>, vector<2x128xf32>,
    %c0_36 = arith.constant 0 : index
    %c768_37 = arith.constant 768 : index
    %31 = vector.load %arg3[%c0_36, %c768_37] : memref<2x1024xf32, #tpu.memory_space<vmem>>, vector<2x128xf32>
    %c112 = arith.constant 112 : index
    %c0_38 = arith.constant 0 : index
    %32 = vector.load %arg5[%c112, %c0_38] : memref<128x128xf32, #tpu.memory_space<vmem>>, vector<2x128xf32>
    tpu.vector_store %arg5[%c112, %c0_38], %31 {strides = array<i32>} : memref<128x128xf32, #tpu.memory_space<vmem>>, vector<2x128xf32>,
    %c0_39 = arith.constant 0 : index
    %c896_40 = arith.constant 896 : index
    %33 = vector.load %arg3[%c0_39, %c896_40] : memref<2x1024xf32, #tpu.memory_space<vmem>>, vector<2x128xf32>
    %c120 = arith.constant 120 : index
    %c0_41 = arith.constant 0 : index
    %34 = vector.load %arg5[%c120, %c0_41] : memref<128x128xf32, #tpu.memory_space<vmem>>, vector<2x128xf32>
    tpu.vector_store %arg5[%c120, %c0_41], %33 {strides = array<i32>} : memref<128x128xf32, #tpu.memory_space<vmem>>, vector<2x128xf32>,
    %c0_42 = arith.constant 0 : index
    %c0_43 = arith.constant 0 : index
    %35 = vector.load %arg5[%c0_42, %c0_43] : memref<128x128xf32, #tpu.memory_space<vmem>>, vector<128x128xf32>
    %c0_44 = arith.constant 0 : index
    %c0_45 = arith.constant 0 : index
    %c0_46 = arith.constant 0 : index
    %36 = vector.load %arg4[%c0_44, %c0_45, %c0_46] : memref<1x128x128xf32, #tpu.memory_space<vmem>>, vector<1x128x128xf32>
    %37 = vector.shape_cast %36 : vector<1x128x128xf32> to vector<128x128xf32>
    %cst = arith.constant dense<0.000000e+00> : vector<128x128xf32>
    %38 = tpu.matmul %35, %35, %cst {dimension_numbers = #tpu.dot_dimension_numbers<[1], [1], [0], [0], [0, 0, 1, 0], [], []>} : vector<128x128xf32>, vector<128x128xf32>, vector<128x128xf32> -> vector<128x128xf32>
    %39 = arith.addf %37, %38 : vector<128x128xf32>
    %c0_47 = arith.constant 0 : index
    %c0_48 = arith.constant 0 : index
    %c0_49 = arith.constant 0 : index
    %40 = vector.load %arg4[%c0_47, %c0_48, %c0_49] : memref<1x128x128xf32, #tpu.memory_space<vmem>>, vector<1x128x128xf32>
    %41 = vector.shape_cast %40 : vector<1x128x128xf32> to vector<128x128xf32>
    %42 = vector.shape_cast %39 : vector<128x128xf32> to vector<1x128x128xf32>
    tpu.vector_store %arg4[%c0_47, %c0_48, %c0_49], %42 {strides = array<i32>} : memref<1x128x128xf32, #tpu.memory_space<vmem>>, vector<1x128x128xf32>,
    return
  }
  func.func @transform_0(%arg0: i32, %arg1: i32) -> (i32, i32) {
    %c1_i32 = arith.constant 1 : i32
    %0 = arith.muli %arg0, %c1_i32 : i32
    %1 = arith.addi %0, %arg1 : i32
    %c0_i32 = arith.constant 0 : i32
    %2 = arith.minsi %1, %c0_i32 : i32
    %c0_i32_0 = arith.constant 0 : i32
    %c0_i32_1 = arith.constant 0 : i32
    return %c0_i32_0, %2 : i32, i32
  }
  func.func @transform_1(%arg0: i32, %arg1: i32) -> (i32, i32) {
    %c1_i32 = arith.constant 1 : i32
    %0 = arith.muli %arg0, %c1_i32 : i32
    %1 = arith.addi %0, %arg1 : i32
    %c0_i32 = arith.constant 0 : i32
    %2 = arith.minsi %1, %c0_i32 : i32
    %c0_i32_0 = arith.constant 0 : i32
    %c0_i32_1 = arith.constant 0 : i32
    return %c0_i32_0, %2 : i32, i32
  }
  func.func @transform_2(%arg0: i32, %arg1: i32) -> (i32, i32, i32) {
    %c0_i32 = arith.constant 0 : i32
    %c0_i32_0 = arith.constant 0 : i32
    %c0_i32_1 = arith.constant 0 : i32
    return %arg0, %c0_i32, %c0_i32_0 : i32, i32, i32
  }
}

</mosaic_0001>

<bundles_post_ra>
// kernel: diff_loss.1
= control target key start
LH: loop header
LB: loop body
LE: loop exit
PB: predicated region body
PF: predicated region fallthrough
CT: control target
= control target key end

     0   :  { %v489_v0 = vmov 0.0   ;;  %s643_s1 = inlined_call_operand.vmem [shape: f32[2,1024], index: 1, kind: input, shape index: {}]   ;;  %s644_s0 = inlined_call_operand.vmem [shape: f32[2,1024], index: 0, kind: input, shape index: {}]   ;;  %s645_s2 = inlined_call_operand.vmem [shape: f32[1,128,128], index: 2, kind: output, shape index: {}]  }
   0x1   :  { %94 = vst [vmem:[#allocation2 + $0x28] sm:$0xff] %v489_v0  ;;  %v141_v1 = vld [vmem:[%s643_s1 + $0xe] sm:$0x3]  ;;  %79 = vst [vmem:[#allocation2 + $0x30] sm:$0xff] %v489_v0  ;;  %v139_v2 = vld [vmem:[%s643_s1 + $0xc] sm:$0x3] }
   0x2   :  { %80 = vst [vmem:[#allocation2] sm:$0xff] %v489_v0  ;;  %81 = vst [vmem:[#allocation2 + $0x58] sm:$0xff] %v489_v0  ;;  %v137_v3 = vld [vmem:[%s643_s1 + $0xa] sm:$0x3]  ;;  %v135_v4 = vld [vmem:[%s643_s1 + $0x8] sm:$0x3] }
   0x3   :  { %82 = vst [vmem:[#allocation2 + $0x18] sm:$0xff] %v489_v0  ;;  %83 = vst [vmem:[#allocation2 + $0x50] sm:$0xff] %v489_v0  ;;  %v133_v5 = vld [vmem:[%s643_s1 + $0x6] sm:$0x3]  ;;  %v131_v6 = vld [vmem:[%s643_s1 + $0x4] sm:$0x3] }
   0x4   :  { %84 = vst [vmem:[#allocation2 + $0x68] sm:$0xff] %v489_v0  ;;  %85 = vst [vmem:[#allocation2 + $0x8] sm:$0xff] %v489_v0  ;;  %v129_v7 = vld [vmem:[%s643_s1 + $0x2] sm:$0x3]  ;;  %v127_v8 = vld [vmem:[%s643_s1] sm:$0x3] }
   0x5   :  { %86 = vst [vmem:[#allocation2 + $0x48] sm:$0xff] %v489_v0  ;;  %87 = vst [vmem:[#allocation2 + $0x40] sm:$0xff] %v489_v0  ;;  %v125_v9 = vld [vmem:[%s644_s0 + $0xe] sm:$0x3]  ;;  %v123_v10 = vld [vmem:[%s644_s0 + $0xc] sm:$0x3] }
   0x6   :  { %88 = vst [vmem:[#allocation2 + $0x20] sm:$0xff] %v489_v0  ;;  %89 = vst [vmem:[#allocation2 + $0x10] sm:$0xff] %v489_v0  ;;  %v121_v11 = vld [vmem:[%s644_s0 + $0xa] sm:$0x3]  ;;  %v119_v12 = vld [vmem:[%s644_s0 + $0x8] sm:$0x3] }
   0x7   :  { %90 = vst [vmem:[#allocation2 + $0x38] sm:$0xff] %v489_v0  ;;  %91 = vst [vmem:[#allocation2 + $0x60] sm:$0xff] %v489_v0  ;;  %v117_v13 = vld [vmem:[%s644_s0 + $0x6] sm:$0x3]  ;;  %v115_v14 = vld [vmem:[%s644_s0 + $0x4] sm:$0x3] }
   0x8   :  { %92 = vst [vmem:[#allocation2 + $0x70] sm:$0xff] %v489_v0  ;;  %93 = vst [vmem:[#allocation2 + $0x78] sm:$0xff] %v489_v0  ;;  %v113_v15 = vld [vmem:[%s644_s0 + $0x2] sm:$0x3]  ;;  %v111_v16 = vld [vmem:[%s644_s0] sm:$0x3] }
   0x9   :  { %142 = vst [vmem:[#allocation2 + $0x28] sm:$0x3] %v141_v1  ;;  %140 = vst [vmem:[#allocation2 + $0x78] sm:$0x3] %v139_v2 }
   0xa   :  { %138 = vst [vmem:[#allocation2 + $0x70] sm:$0x3] %v137_v3  ;;  %136 = vst [vmem:[#allocation2 + $0x60] sm:$0x3] %v135_v4 }
   0xb   :  { %134 = vst [vmem:[#allocation2 + $0x38] sm:$0x3] %v133_v5  ;;  %132 = vst [vmem:[#allocation2 + $0x10] sm:$0x3] %v131_v6 }
   0xc   :  { %130 = vst [vmem:[#allocation2 + $0x20] sm:$0x3] %v129_v7  ;;  %128 = vst [vmem:[#allocation2 + $0x40] sm:$0x3] %v127_v8 }
   0xd   :  { %126 = vst [vmem:[#allocation2 + $0x48] sm:$0x3] %v125_v9  ;;  %124 = vst [vmem:[#allocation2 + $0x8] sm:$0x3] %v123_v10 }
   0xe   :  { %122 = vst [vmem:[#allocation2 + $0x68] sm:$0x3] %v121_v11  ;;  %120 = vst [vmem:[#allocation2 + $0x50] sm:$0x3] %v119_v12 }
   0xf   :  { %118 = vst [vmem:[#allocation2 + $0x18] sm:$0x3] %v117_v13  ;;  %116 = vst [vmem:[#allocation2 + $0x58] sm:$0x3] %v115_v14 }
  0x10   :  { %114 = vst [vmem:[#allocation2] sm:$0x3] %v113_v15  ;;  %112 = vst [vmem:[#allocation2 + $0x30] sm:$0x3] %v111_v16  ;;  %v553_v17 = vld [vmem:[#allocation2 + $0x28] sm:$0xff]  ;;  %v555_v18 = vld [vmem:[#allocation2 + $0x78] sm:$0xff] }
  0x11   :  { %400 = vmatprep.subr.mxu0 %v553_v17  ;;  %456 = vmatprep.subr.mxu1 %v553_v17  ;;  %v563_v20 = vld [vmem:[#allocation2 + $0x70] sm:$0xff]  ;;  %v571_v22 = vld [vmem:[#allocation2 + $0x60] sm:$0xff] }
  0x12   :  { %401 = vmatpush3.xpose.msra.mxu0 %v553_v17  ;;  %472 = vmatpush3.xpose.msra.mxu1 %v553_v17  ;;  %v578_v23 = vld [vmem:[#allocation2 + $0x38] sm:$0xff]  ;;  %v153_v24 = vld [vmem:[#allocation2 + $0x10] sm:$0xff] }
  0x13   :  { %402 = vmatprep.subr.mxu0 %v555_v18  ;;  %457 = vmatprep.subr.mxu1 %v555_v18  ;;  %v151_v19 = vld [vmem:[#allocation2 + $0x40] sm:$0xff] }
  0x14   :  { %444 = vmatprep.mubr.f32.mxu1 %v151_v19  ;;  %v152_v25 = vld [vmem:[#allocation2 + $0x20] sm:$0xff]  ;;  %v150_v26 = vld [vmem:[#allocation2 + $0x48] sm:$0xff] }
  0x15   :  { %v149_v27 = vld [vmem:[#allocation2 + $0x8] sm:$0xff]  ;;  %v147_v29 = vld [vmem:[#allocation2 + $0x50] sm:$0xff] }
  0x16   :  { %403 = vmatpush3.xpose.msra.mxu0 %v555_v18  ;;  %473 = vmatpush3.xpose.msra.mxu1 %v555_v18  ;;  %v148_v28 = vld [vmem:[#allocation2 + $0x68] sm:$0xff]  ;;  %v146_v30 = vld [vmem:[#allocation2 + $0x18] sm:$0xff] }
  0x17   :  { %404 = vmatprep.subr.mxu0 %v563_v20  ;;  %458 = vmatprep.subr.mxu1 %v563_v20  ;;  %v569_v21 = vld [vmem:[#allocation2 + $0x30] sm:$0xff]  ;;  %v145_v31 = vld [vmem:[#allocation2 + $0x58] sm:$0xff]  ;;  %v144_v32 = vld [vmem:[#allocation2] sm:$0xff] }
  0x18   :  { %432 = vmatprep.mubr.f32.mxu0 %v569_v21 }
  0x1a   :  { %405 = vmatpush3.xpose.msra.mxu0 %v563_v20  ;;  %474 = vmatpush3.xpose.msra.mxu1 %v563_v20 }
  0x1b   :  { %406 = vmatprep.subr.mxu0 %v571_v22  ;;  %459 = vmatprep.subr.mxu1 %v571_v22 }
  0x1e   :  { %407 = vmatpush3.xpose.msra.mxu0 %v571_v22  ;;  %475 = vmatpush3.xpose.msra.mxu1 %v571_v22 }
  0x1f   :  { %408 = vmatprep.subr.mxu0 %v578_v23  ;;  %460 = vmatprep.subr.mxu1 %v578_v23 }
  0x22   :  { %409 = vmatpush3.xpose.msra.mxu0 %v578_v23  ;;  %476 = vmatpush3.xpose.msra.mxu1 %v578_v23 }
  0x23   :  { %410 = vmatprep.subr.mxu0 %v153_v24  ;;  %461 = vmatprep.subr.mxu1 %v153_v24 }
  0x26   :  { %411 = vmatpush3.xpose.msra.mxu0 %v153_v24  ;;  %477 = vmatpush3.xpose.msra.mxu1 %v153_v24 }
  0x27   :  { %412 = vmatprep.subr.mxu0 %v152_v25  ;;  %462 = vmatprep.subr.mxu1 %v152_v25 }
  0x2a   :  { %413 = vmatpush3.xpose.msra.mxu0 %v152_v25  ;;  %478 = vmatpush3.xpose.msra.mxu1 %v152_v25 }
  0x2b   :  { %414 = vmatprep.subr.mxu0 %v151_v19  ;;  %463 = vmatprep.subr.mxu1 %v151_v19 }
  0x2e   :  { %415 = vmatpush3.xpose.msra.mxu0 %v151_v19  ;;  %479 = vmatpush3.xpose.msra.mxu1 %v151_v19 }
  0x2f   :  { %416 = vmatprep.subr.mxu0 %v150_v26  ;;  %464 = vmatprep.subr.mxu1 %v150_v26 }
  0x32   :  { %417 = vmatpush3.xpose.msra.mxu0 %v150_v26  ;;  %480 = vmatpush3.xpose.msra.mxu1 %v150_v26 }
  0x33   :  { %418 = vmatprep.subr.mxu0 %v149_v27  ;;  %465 = vmatprep.subr.mxu1 %v149_v27 }
  0x36   :  { %419 = vmatpush3.xpose.msra.mxu0 %v149_v27  ;;  %481 = vmatpush3.xpose.msra.mxu1 %v149_v27 }
  0x37   :  { %420 = vmatprep.subr.mxu0 %v148_v28  ;;  %466 = vmatprep.subr.mxu1 %v148_v28 }
  0x3a   :  { %421 = vmatpush3.xpose.msra.mxu0 %v148_v28  ;;  %482 = vmatpush3.xpose.msra.mxu1 %v148_v28 }
  0x3b   :  { %422 = vmatprep.subr.mxu0 %v147_v29  ;;  %467 = vmatprep.subr.mxu1 %v147_v29 }
  0x3e   :  { %423 = vmatpush3.xpose.msra.mxu0 %v147_v29  ;;  %483 = vmatpush3.xpose.msra.mxu1 %v147_v29 }
  0x3f   :  { %424 = vmatprep.subr.mxu0 %v146_v30  ;;  %468 = vmatprep.subr.mxu1 %v146_v30 }
  0x42   :  { %425 = vmatpush3.xpose.msra.mxu0 %v146_v30  ;;  %484 = vmatpush3.xpose.msra.mxu1 %v146_v30 }
  0x43   :  { %426 = vmatprep.subr.mxu0 %v145_v31  ;;  %469 = vmatprep.subr.mxu1 %v145_v31 }
  0x46   :  { %427 = vmatpush3.xpose.msra.mxu0 %v145_v31  ;;  %485 = vmatpush3.xpose.msra.mxu1 %v145_v31 }
  0x47   :  { %428 = vmatprep.subr.mxu0 %v144_v32  ;;  %470 = vmatprep.subr.mxu1 %v144_v32 }
  0x4a   :  { %429 = vmatpush3.xpose.msra.mxu0 %v144_v32  ;;  %486 = vmatpush3.xpose.msra.mxu1 %v144_v32 }
  0x4b   :  { %430 = vmatprep.subr.mxu0 %v569_v21  ;;  %471 = vmatprep.subr.mxu1 %v569_v21 }
  0x4e   :  { %431 = vmatpush3.xpose.msra.mxu0 %v569_v21  ;;  %487 = vmatpush3.xpose.msra.mxu1 %v569_v21 }
  0x51   :  { %433 = vmatmul.mubr.f32.vlgmr.msra.gmra.mxu0 %v144_v32  ;;  %445 = vmatmul.mubr.f32.vlgmr.msra.gmra.mxu1 %v152_v25 }
  0x52   :  { %435 = vmatprep.mubr.f32.mxu0 %v145_v31  ;;  %447 = vmatprep.mubr.f32.mxu1 %v153_v24 }
  0x55   :  { %436 = vmatmul.mubr.f32.gmra.mxu0 %v146_v30  ;;  %448 = vmatmul.mubr.f32.gmra.mxu1 %v578_v23 }
  0x56   :  { %438 = vmatprep.mubr.f32.mxu0 %v147_v29  ;;  %450 = vmatprep.mubr.f32.mxu1 %v571_v22 }
  0x59   :  { %439 = vmatmul.mubr.f32.gmra.mxu0 %v148_v28  ;;  %451 = vmatmul.mubr.f32.gmra.mxu1 %v563_v20 }
  0x5a   :  { %441 = vmatprep.mubr.f32.mxu0 %v149_v27  ;;  %453 = vmatprep.mubr.f32.mxu1 %v555_v18 }
  0x5d   :  { %442 = vmatmul.mubr.f32.gmra.mxu0 %v150_v26  ;;  %454 = vmatmul.mubr.f32.gmra.mxu1 %v553_v17 }
 0x111   :  { %v434_v33 = vpop.f32.mrf.mxu0  ;;  %v446_v34 = vpop.f32.mrf.mxu1 }
 0x112   :  { %337 = vst [vmem:[%s645_s2 + $0x8] sm:$0xff] %v434_v33  ;;  %345 = vst [vmem:[%s645_s2 + $0x48] sm:$0xff] %v446_v34 }
 0x113   :  { %v241_v35 = vpop.f32.mrf.mxu0  ;;  %v281_v36 = vpop.f32.mrf.mxu1 }
 0x114   :  { %336 = vst [vmem:[%s645_s2] sm:$0xff] %v241_v35  ;;  %344 = vst [vmem:[%s645_s2 + $0x40] sm:$0xff] %v281_v36 }
 0x115   :  { %v437_v37 = vpop.f32.mrf.mxu0  ;;  %v449_v38 = vpop.f32.mrf.mxu1 }
 0x116   :  { %339 = vst [vmem:[%s645_s2 + $0x18] sm:$0xff] %v437_v37  ;;  %347 = vst [vmem:[%s645_s2 + $0x58] sm:$0xff] %v449_v38 }
 0x117   :  { %v251_v39 = vpop.f32.mrf.mxu0  ;;  %v291_v40 = vpop.f32.mrf.mxu1 }
 0x118   :  { %338 = vst [vmem:[%s645_s2 + $0x10] sm:$0xff] %v251_v39  ;;  %346 = vst [vmem:[%s645_s2 + $0x50] sm:$0xff] %v291_v40 }
 0x119   :  { %v440_v41 = vpop.f32.mrf.mxu0  ;;  %v452_v42 = vpop.f32.mrf.mxu1 }
 0x11a   :  { %341 = vst [vmem:[%s645_s2 + $0x28] sm:$0xff] %v440_v41  ;;  %349 = vst [vmem:[%s645_s2 + $0x68] sm:$0xff] %v452_v42 }
 0x11b   :  { %v261_v43 = vpop.f32.mrf.mxu0  ;;  %v301_v44 = vpop.f32.mrf.mxu1 }
 0x11c   :  { %340 = vst [vmem:[%s645_s2 + $0x20] sm:$0xff] %v261_v43  ;;  %348 = vst [vmem:[%s645_s2 + $0x60] sm:$0xff] %v301_v44 }
 0x11d   :  { %v443_v45 = vpop.f32.mrf.mxu0  ;;  %v455_v46 = vpop.f32.mrf.mxu1 }
 0x11e   :  { %343 = vst [vmem:[%s645_s2 + $0x38] sm:$0xff] %v443_v45  ;;  %351 = vst [vmem:[%s645_s2 + $0x78] sm:$0xff] %v455_v46 }
 0x11f   :  { %v271_v47 = vpop.f32.mrf.mxu0  ;;  %v311_v48 = vpop.f32.mrf.mxu1 }
 0x120   :  { %342 = vst [vmem:[%s645_s2 + $0x30] sm:$0xff] %v271_v47  ;;  %350 = vst [vmem:[%s645_s2 + $0x70] sm:$0xff] %v311_v48 }

</bundles_post_ra>
